<compile_context>
chip_gen: v7x
topology: tpu7x:2x2x1
jax: 0.10.0
libtpu: 0.0.40
codegen_flags: <defaults>
</compile_context>

<pallas_src>
import functools

import jax
import jax.numpy as jnp
import numpy as np
from jax import lax
from jax.experimental import pallas as pl
from jax.experimental.pallas import tpu as pltpu

# ------------- configuration (GroupNorm(23, out_c) => out_c % 23 == 0) -------
N_BATCH = 2
IN_C = 4
OUT_C = 46            # 2 channels per group, 23 groups
H = W = 16
GROUPS = 23
CG = OUT_C // GROUPS  # channels per group
EPS = 1e-6
NEG_SLOPE = 0.01      # torch LeakyReLU default


# --------------------------------- kernel ------------------------------------
def cnn_enc_kernel(col_ref, w_ref, p_ref, gb_ref, o_ref, *, eps, neg_slope,
                   n_batch, hw):
    # col_ref : (9*Cin, N*HW)  im2col patches, tap-major/cin-minor rows,
    #                          batch-major/hw-minor lanes
    # w_ref   : (Cout, 9*Cin)  conv weight, same row ordering as col
    # p_ref   : (Cout, Cout)   group-averaging matrix, 1/(HW*CG) within group
    # gb_ref  : (Cout, 2)      col 0 = gamma, col 1 = beta
    # o_ref   : (N, Cout, HW)  lane-dense output (HW = 256 lanes)

    # --- convolution: single lane-dense MXU matmul over the merged batch ---
    acc = jnp.dot(w_ref[...], col_ref[...],
                  preferred_element_type=jnp.float32)          # (Cout, N*HW)

    gamma = gb_ref[:, 0:1]                                     # (Cout, 1)
    beta = gb_ref[:, 1:2]                                      # (Cout, 1)

    # --- per-batch GroupNorm(23) + affine + LeakyReLU (static unroll, N=2) ---
    for b in range(n_batch):
        a = acc[:, b * hw:(b + 1) * hw]                        # (Cout, HW), 128-aligned lanes

        sums = jnp.sum(a, axis=1, keepdims=True)               # (Cout, 1)  XLU
        sqs = jnp.sum(a * a, axis=1, keepdims=True)            # (Cout, 1)  VPU+XLU

        # one tiny matmul for both stats: (Cout,Cout)@(Cout,2)
        stats = jnp.dot(p_ref[...], jnp.concatenate([sums, sqs], axis=1),
                        preferred_element_type=jnp.float32)    # (Cout, 2)
        mean_c = stats[:, 0:1]
        var_c = jnp.maximum(stats[:, 1:2] - mean_c * mean_c, 0.0)  # biased (torch), clamped
        inv_c = lax.rsqrt(var_c + eps)

        # affine folded into per-channel scale/shift (2 full-tile VPU ops)
        scale = inv_c * gamma                                  # (Cout, 1)
        shift = beta - mean_c * scale                          # (Cout, 1)
        y = a * scale + shift                                  # (Cout, HW)

        # LeakyReLU: single vmax
        y = jnp.maximum(y, neg_slope * y)

        o_ref[b] = y.astype(o_ref.dtype)


# --------------------------------- wrapper -----------------------------------
@jax.jit
def cnn_encoder_ln(x_nchw, conv_w, gamma, beta):
    """x_nchw: (N, Cin, H, W) f32; conv_w: (Cout, Cin, 3, 3); gamma/beta: (Cout,)."""
    n, cin, h, w = x_nchw.shape
    cout = conv_w.shape[0]
    hw = h * w

    # zero-pad spatially (padding=1) and build im2col with the batch merged into
    # the lane dimension: (9*Cin, N*HW).  All of this fuses under jit.
    xp = jnp.pad(x_nchw, ((0, 0), (0, 0), (1, 1), (1, 1)))     # (N, Cin, H+2, W+2)
    taps = []
    for dy in range(3):
        for dx in range(3):
            taps.append(xp[:, :, dy:dy + h, dx:dx + w])        # (N, Cin, H, W)
    col = jnp.stack(taps, axis=0)                              # (9, N, Cin, H, W)
    col = jnp.transpose(col, (0, 2, 1, 3, 4)).reshape(9 * cin, n * hw)

    # conv weight (Cout, Cin, 3, 3) -> (Cout, 3, 3, Cin) -> (Cout, 9*Cin)
    # (row ordering = tap-major, cin-minor, matching `col`)
    w_mat = jnp.transpose(conv_w, (0, 2, 3, 1)).reshape(cout, 9 * cin)

    # group-averaging matrix with 1/(HW*CG) folded in (compile-time constant)
    ch = np.arange(cout)
    same_group = (ch[:, None] // CG) == (ch[None, :] // CG)
    p_mat = jnp.asarray(same_group.astype(np.float32) / float(hw * CG))  # (Cout, Cout)

    # gamma/beta packed into a single (Cout, 2) input
    gb = jnp.stack([gamma.astype(jnp.float32), beta.astype(jnp.float32)],
                   axis=1)                                     # (Cout, 2)

    kernel = functools.partial(cnn_enc_kernel, eps=EPS, neg_slope=NEG_SLOPE,
                               n_batch=n, hw=hw)

    out_flat = pl.pallas_call(
        kernel,
        out_shape=jax.ShapeDtypeStruct((n, cout, hw), jnp.float32),
        grid=(1,),                                             # single invocation
        in_specs=[
            pl.BlockSpec((9 * cin, n * hw), lambda i: (0, 0)),  # im2col (lanes = N*HW)
            pl.BlockSpec((cout, 9 * cin), lambda i: (0, 0)),    # conv weight
            pl.BlockSpec((cout, cout), lambda i: (0, 0)),       # P (group avg)
            pl.BlockSpec((cout, 2), lambda i: (0, 0)),          # gamma|beta
        ],
        out_specs=pl.BlockSpec((n, cout, hw), lambda i: (0, 0, 0)),  # lane-dense
        compiler_params=pltpu.CompilerParams(
            dimension_semantics=("arbitrary",)),
    )(col, w_mat, p_mat, gb)

    # (N, Cout, HW) reshapes directly to NCHW — no transpose needed
    return out_flat.reshape(n, cout, h, w)


# ------------------------------ pure-JAX reference ----------------------------
def reference(x_nchw, conv_w, gamma, beta):
    out = lax.conv_general_dilated(
        x_nchw, conv_w, window_strides=(1, 1), padding="SAME",
        dimension_numbers=("NCHW", "OIHW", "NCHW"))
    n, c, h, w = out.shape
    o = out.reshape(n, GROUPS, CG * h * w)
    mean = o.mean(axis=2, keepdims=True)
    var = o.var(axis=2, keepdims=True)
    o = (o - mean) / jnp.sqrt(var + EPS)
    o = o.reshape(n, c, h, w)
    o = o * gamma[None, :, None, None] + beta[None, :, None, None]
    return jnp.where(o >= 0, o, NEG_SLOPE * o)


# ------------------------------------ main ------------------------------------
if __name__ == "__main__":
    key = jax.random.PRNGKey(0)
    k_x, k_w, k_g, k_b = jax.random.split(key, 4)

    x = jax.random.normal(k_x, (N_BATCH, IN_C, H, W), dtype=jnp.float32)
    # Conv2d weight (out_c, in_c, 3, 3), bias=False; deterministic init
    fan_in = IN_C * 3 * 3
    conv_w = jax.random.normal(k_w, (OUT_C, IN_C, 3, 3), dtype=jnp.float32) / np.sqrt(fan_in)
    # GroupNorm affine params (deterministic, non-trivial)
    gamma = 1.0 + 0.1 * jax.random.normal(k_g, (OUT_C,), dtype=jnp.float32)
    beta = 0.1 * jax.random.normal(k_b, (OUT_C,), dtype=jnp.float32)

    out = cnn_encoder_ln(x, conv_w, gamma, beta)
    out = jax.block_until_ready(out)

    ref = jax.block_until_ready(reference(x, conv_w, gamma, beta))
    assert out.shape == (N_BATCH, OUT_C, H, W)
    np.testing.assert_allclose(np.asarray(out), np.asarray(ref),
                               rtol=1e-4, atol=1e-4)
    print("KERNEL_OK")
</pallas_src>

<mosaic_0001>
module attributes {stable_mosaic.version = 11 : i64} {
  func.func @cnn_enc_kernel(%arg0: i32, %arg1: memref<36x512xf32, #tpu.memory_space<vmem>>, %arg2: memref<46x36xf32, #tpu.memory_space<vmem>>, %arg3: memref<46x46xf32, #tpu.memory_space<vmem>>, %arg4: memref<46x2xf32, #tpu.memory_space<vmem>>, %arg5: memref<2x46x256xf32, #tpu.memory_space<vmem>>) attributes {dimension_semantics = [#tpu.dimension_semantics<arbitrary>], iteration_bounds = array<i64: 1>, scalar_prefetch = 0 : i64, scratch_operands = 0 : i64, tpu.core_type = #tpu.core_type<tc>, window_params = [{pipeline_mode = #tpu.pipeline_mode<synchronous>, transform_indices = @transform_0, window_bounds = array<i64: 36, 512>}, {pipeline_mode = #tpu.pipeline_mode<synchronous>, transform_indices = @transform_1, window_bounds = array<i64: 46, 36>}, {pipeline_mode = #tpu.pipeline_mode<synchronous>, transform_indices = @transform_2, window_bounds = array<i64: 46, 46>}, {pipeline_mode = #tpu.pipeline_mode<synchronous>, transform_indices = @transform_3, window_bounds = array<i64: 46, 2>}, {pipeline_mode = #tpu.pipeline_mode<synchronous>, transform_indices = @transform_4, window_bounds = array<i64: 2, 46, 256>}]} {
    %c0 = arith.constant 0 : index
    %c0_0 = arith.constant 0 : index
    %0 = vector.load %arg2[%c0, %c0_0] : memref<46x36xf32, #tpu.memory_space<vmem>>, vector<46x36xf32>
    %c0_1 = arith.constant 0 : index
    %c0_2 = arith.constant 0 : index
    %1 = vector.load %arg1[%c0_1, %c0_2] : memref<36x512xf32, #tpu.memory_space<vmem>>, vector<36x512xf32>
    %cst = arith.constant dense<0.000000e+00> : vector<46x512xf32>
    %2 = tpu.matmul %0, %1, %cst {dimension_numbers = #tpu.dot_dimension_numbers<[1], [0], [0], [1], [0, 0, 1, 1], [], []>} : vector<46x36xf32>, vector<36x512xf32>, vector<46x512xf32> -> vector<46x512xf32>
    %c0_3 = arith.constant 0 : index
    %c0_4 = arith.constant 0 : index
    %3 = vector.load %arg4[%c0_3, %c0_4] : memref<46x2xf32, #tpu.memory_space<vmem>>, vector<46x1xf32>
    %c0_5 = arith.constant 0 : index
    %c1 = arith.constant 1 : index
    %4 = vector.load %arg4[%c0_5, %c1] : memref<46x2xf32, #tpu.memory_space<vmem>>, vector<46x1xf32>
    %5 = vector.extract_strided_slice %2 {offsets = [0, 0], sizes = [46, 256], strides = [1, 1]} : vector<46x512xf32> to vector<46x256xf32>
    %cst_6 = arith.constant dense<0.000000e+00> : vector<46xf32>
    %6 = vector.multi_reduction <add>, %5, %cst_6 [1] : vector<46x256xf32> to vector<46xf32>
    %7 = vector.shape_cast %6 : vector<46xf32> to vector<46x1xf32>
    %8 = arith.mulf %5, %5 : vector<46x256xf32>
    %cst_7 = arith.constant dense<0.000000e+00> : vector<46xf32>
    %9 = vector.multi_reduction <add>, %8, %cst_7 [1] : vector<46x256xf32> to vector<46xf32>
    %10 = vector.shape_cast %9 : vector<46xf32> to vector<46x1xf32>
    %c0_8 = arith.constant 0 : index
    %c0_9 = arith.constant 0 : index
    %11 = vector.load %arg3[%c0_8, %c0_9] : memref<46x46xf32, #tpu.memory_space<vmem>>, vector<46x46xf32>
    %12 = tpu.concatenate %7, %10 in 1 : vector<46x1xf32>, vector<46x1xf32> -> vector<46x2xf32>
    %cst_10 = arith.constant dense<0.000000e+00> : vector<46x2xf32>
    %13 = tpu.matmul %11, %12, %cst_10 {dimension_numbers = #tpu.dot_dimension_numbers<[1], [0], [0], [1], [0, 0, 1, 1], [], []>} : vector<46x46xf32>, vector<46x2xf32>, vector<46x2xf32> -> vector<46x2xf32>
    %14 = vector.extract_strided_slice %13 {offsets = [0, 0], sizes = [46, 1], strides = [1, 1]} : vector<46x2xf32> to vector<46x1xf32>
    %15 = vector.extract_strided_slice %13 {offsets = [0, 1], sizes = [46, 1], strides = [1, 1]} : vector<46x2xf32> to vector<46x1xf32>
    %16 = arith.mulf %14, %14 : vector<46x1xf32>
    %17 = arith.subf %15, %16 : vector<46x1xf32>
    %cst_11 = arith.constant 0.000000e+00 : f32
    %18 = vector.broadcast %cst_11 : f32 to vector<46x1xf32>
    %19 = arith.maximumf %17, %18 : vector<46x1xf32>
    %cst_12 = arith.constant 9.99999997E-7 : f32
    %20 = vector.broadcast %cst_12 : f32 to vector<46x1xf32>
    %21 = arith.addf %19, %20 : vector<46x1xf32>
    %22 = math.rsqrt %21 : vector<46x1xf32>
    %23 = arith.mulf %22, %3 : vector<46x1xf32>
    %24 = arith.mulf %14, %23 : vector<46x1xf32>
    %25 = arith.subf %4, %24 : vector<46x1xf32>
    %26 = vector.broadcast %23 : vector<46x1xf32> to vector<46x256xf32>
    %27 = arith.mulf %5, %26 : vector<46x256xf32>
    %28 = vector.broadcast %25 : vector<46x1xf32> to vector<46x256xf32>
    %29 = arith.addf %27, %28 : vector<46x256xf32>
    %cst_13 = arith.constant 0.00999999977 : f32
    %30 = vector.broadcast %cst_13 : f32 to vector<46x256xf32>
    %31 = arith.mulf %30, %29 : vector<46x256xf32>
    %32 = arith.maximumf %29, %31 : vector<46x256xf32>
    %c0_14 = arith.constant 0 : index
    %c0_15 = arith.constant 0 : index
    %c0_16 = arith.constant 0 : index
    %33 = vector.load %arg5[%c0_14, %c0_15, %c0_16] : memref<2x46x256xf32, #tpu.memory_space<vmem>>, vector<1x46x256xf32>
    %34 = vector.shape_cast %33 : vector<1x46x256xf32> to vector<46x256xf32>
    %35 = vector.shape_cast %32 : vector<46x256xf32> to vector<1x46x256xf32>
    tpu.vector_store %arg5[%c0_14, %c0_15, %c0_16], %35 {strides = array<i32>} : memref<2x46x256xf32, #tpu.memory_space<vmem>>, vector<1x46x256xf32>,
    %36 = vector.extract_strided_slice %2 {offsets = [0, 256], sizes = [46, 256], strides = [1, 1]} : vector<46x512xf32> to vector<46x256xf32>
    %cst_17 = arith.constant dense<0.000000e+00> : vector<46xf32>
    %37 = vector.multi_reduction <add>, %36, %cst_17 [1] : vector<46x256xf32> to vector<46xf32>
    %38 = vector.shape_cast %37 : vector<46xf32> to vector<46x1xf32>
    %39 = arith.mulf %36, %36 : vector<46x256xf32>
    %cst_18 = arith.constant dense<0.000000e+00> : vector<46xf32>
    %40 = vector.multi_reduction <add>, %39, %cst_18 [1] : vector<46x256xf32> to vector<46xf32>
    %41 = vector.shape_cast %40 : vector<46xf32> to vector<46x1xf32>
    %c0_19 = arith.constant 0 : index
    %c0_20 = arith.constant 0 : index
    %42 = vector.load %arg3[%c0_19, %c0_20] : memref<46x46xf32, #tpu.memory_space<vmem>>, vector<46x46xf32>
    %43 = tpu.concatenate %38, %41 in 1 : vector<46x1xf32>, vector<46x1xf32> -> vector<46x2xf32>
    %cst_21 = arith.constant dense<0.000000e+00> : vector<46x2xf32>
    %44 = tpu.matmul %42, %43, %cst_21 {dimension_numbers = #tpu.dot_dimension_numbers<[1], [0], [0], [1], [0, 0, 1, 1], [], []>} : vector<46x46xf32>, vector<46x2xf32>, vector<46x2xf32> -> vector<46x2xf32>
    %45 = vector.extract_strided_slice %44 {offsets = [0, 0], sizes = [46, 1], strides = [1, 1]} : vector<46x2xf32> to vector<46x1xf32>
    %46 = vector.extract_strided_slice %44 {offsets = [0, 1], sizes = [46, 1], strides = [1, 1]} : vector<46x2xf32> to vector<46x1xf32>
    %47 = arith.mulf %45, %45 : vector<46x1xf32>
    %48 = arith.subf %46, %47 : vector<46x1xf32>
    %cst_22 = arith.constant 0.000000e+00 : f32
    %49 = vector.broadcast %cst_22 : f32 to vector<46x1xf32>
    %50 = arith.maximumf %48, %49 : vector<46x1xf32>
    %cst_23 = arith.constant 9.99999997E-7 : f32
    %51 = vector.broadcast %cst_23 : f32 to vector<46x1xf32>
    %52 = arith.addf %50, %51 : vector<46x1xf32>
    %53 = math.rsqrt %52 : vector<46x1xf32>
    %54 = arith.mulf %53, %3 : vector<46x1xf32>
    %55 = arith.mulf %45, %54 : vector<46x1xf32>
    %56 = arith.subf %4, %55 : vector<46x1xf32>
    %57 = vector.broadcast %54 : vector<46x1xf32> to vector<46x256xf32>
    %58 = arith.mulf %36, %57 : vector<46x256xf32>
    %59 = vector.broadcast %56 : vector<46x1xf32> to vector<46x256xf32>
    %60 = arith.addf %58, %59 : vector<46x256xf32>
    %cst_24 = arith.constant 0.00999999977 : f32
    %61 = vector.broadcast %cst_24 : f32 to vector<46x256xf32>
    %62 = arith.mulf %61, %60 : vector<46x256xf32>
    %63 = arith.maximumf %60, %62 : vector<46x256xf32>
    %c1_25 = arith.constant 1 : index
    %c0_26 = arith.constant 0 : index
    %c0_27 = arith.constant 0 : index
    %64 = vector.load %arg5[%c1_25, %c0_26, %c0_27] : memref<2x46x256xf32, #tpu.memory_space<vmem>>, vector<1x46x256xf32>
    %65 = vector.shape_cast %64 : vector<1x46x256xf32> to vector<46x256xf32>
    %66 = vector.shape_cast %63 : vector<46x256xf32> to vector<1x46x256xf32>
    tpu.vector_store %arg5[%c1_25, %c0_26, %c0_27], %66 {strides = array<i32>} : memref<2x46x256xf32, #tpu.memory_space<vmem>>, vector<1x46x256xf32>,
    return
  }
  func.func @transform_0(%arg0: i32) -> (i32, i32) {
    %c0_i32 = arith.constant 0 : i32
    %c0_i32_0 = arith.constant 0 : i32
    %c0_i32_1 = arith.constant 0 : i32
    return %c0_i32, %c0_i32_0 : i32, i32
  }
  func.func @transform_1(%arg0: i32) -> (i32, i32) {
    %c0_i32 = arith.constant 0 : i32
    %c0_i32_0 = arith.constant 0 : i32
    %c0_i32_1 = arith.constant 0 : i32
    return %c0_i32, %c0_i32_0 : i32, i32
  }
  func.func @transform_2(%arg0: i32) -> (i32, i32) {
    %c0_i32 = arith.constant 0 : i32
    %c0_i32_0 = arith.constant 0 : i32
    %c0_i32_1 = arith.constant 0 : i32
    return %c0_i32, %c0_i32_0 : i32, i32
  }
  func.func @transform_3(%arg0: i32) -> (i32, i32) {
    %c0_i32 = arith.constant 0 : i32
    %c0_i32_0 = arith.constant 0 : i32
    %c0_i32_1 = arith.constant 0 : i32
    return %c0_i32, %c0_i32_0 : i32, i32
  }
  func.func @transform_4(%arg0: i32) -> (i32, i32, i32) {
    %c0_i32 = arith.constant 0 : i32
    %c0_i32_0 = arith.constant 0 : i32
    %c0_i32_1 = arith.constant 0 : i32
    %c0_i32_2 = arith.constant 0 : i32
    return %c0_i32, %c0_i32_0, %c0_i32_1 : i32, i32, i32
  }
}

</mosaic_0001>

<bundles_post_ra>
// kernel: cnn_encoder_ln.1
= control target key start
LH: loop header
LB: loop body
LE: loop exit
PB: predicated region body
PF: predicated region fallthrough
CT: control target
= control target key end

     0   :  { %v1326_v3 = vmov 0.0   ;;  %vm62_vm0 = vcmask 1043456   ;;  %vm43_vm1 = vcmask 293888   ;;  %vm298_vm2 = vcmask 1045504   ;;  %s1328_s27 = smov 1   ;;  %s1934_s0 = inlined_call_operand.vmem [shape: f32[36,512], index: 0, kind: input, shape index: {}]   ;;  %s1935_s1 = inlined_call_operand.vmem [shape: f32[46,36], index: 1, kind: input, shape index: {}]   ;;  %s1936_s2 = inlined_call_operand.vmem [shape: f32[46,46], index: 2, kind: input, shape index: {}]   ;;  %s1937_s3 = inlined_call_operand.vmem [shape: f32[46,2], index: 3, kind: input, shape index: {}]   ;;  %s1938_s4 = inlined_call_operand.vmem [shape: f32[2,46,256], index: 4, kind: output, shape index: {}]  }
   0x1   :  { %v24_v0 = vld [vmem:[%s1934_s0 + $0x8] sm:$0xff]  ;;  %v23_v2 = vld [vmem:[%s1934_s0] sm:$0xff]  ;;  %139 = vmatprep.mubr.f32.mxu0 %v1326_v3  ;;  %240 = vmatprep.mubr.f32.mxu1 %v1326_v3  ;;  %v26_v6 = vld [vmem:[%s1934_s0 + $0x18] sm:$0xff]  ;;  %vm349_vm3 = vcmask 375808   ;;  %vm342_vm4 = vcmask 7168   ;;  %vm1327_vm5 = vmmov 1  }
   0x2   :  { %v28_v1 = vld [vmem:[%s1934_s0 + $0x28] sm:$0xff]  ;;  %v27_v5 = vld [vmem:[%s1934_s0 + $0x20] sm:$0xff]  ;;  %v30_v7 = vld [vmem:[%s1934_s0 + $0x38] sm:$0xff] }
   0x3   :  { %v1251_v4 = vpack.c.bf16 %v28_v1, %v24_v0  ;;  %v1253_v8 = vpack.c.bf16 %v27_v5, %v23_v2  ;;  %v1259_v9 = vpack.c.bf16 %v30_v7, %v26_v6  ;;  %v25_v10 = vld [vmem:[%s1934_s0 + $0x10] sm:$0xff]  ;;  %v32_v12 = vld [vmem:[%s1934_s0 + $0x48] sm:$0xff]  ;;  %v31_v15 = vld [vmem:[%s1934_s0 + $0x40] sm:$0xff] }
   0x4   :  { %v29_v11 = vld [vmem:[%s1934_s0 + $0x30] sm:$0xff]  ;;  %v36_v14 = vld [vmem:[%s1934_s0 + $0x68] sm:$0xff]  ;;  %v35_v16 = vld [vmem:[%s1934_s0 + $0x60] sm:$0xff] }
   0x5   :  { %1252 = vmatprep.subr.bf16.mxu0 %v1251_v4  ;;  %v1261_v13 = vpack.c.bf16 %v29_v11, %v25_v10  ;;  %1260 = vmatprep.subr.bf16.mxu1 %v1259_v9  ;;  %v1255_v17 = vpack.c.bf16 %v36_v14, %v32_v12  ;;  %v1257_v18 = vpack.c.bf16 %v35_v16, %v31_v15  ;;  %v34_v19 = vld [vmem:[%s1934_s0 + $0x58] sm:$0xff]  ;;  %v33_v21 = vld [vmem:[%s1934_s0 + $0x50] sm:$0xff]  ;;  %v40_v25 = vld [vmem:[%s1934_s0 + $0x88] sm:$0xf] }
   0x6   :  { %1254 = vmatpush1.bf16.msra.mxu0 %v1253_v8  ;;  %v38_v20 = vld [vmem:[%s1934_s0 + $0x78] sm:$0xff]  ;;  %v37_v23 = vld [vmem:[%s1934_s0 + $0x70] sm:$0xff]  ;;  %v39_v27 = vld [vmem:[%s1934_s0 + $0x80] sm:$0xf] }
   0x7   :  { %1262 = vmatpush1.bf16.msra.mxu1 %v1261_v13  ;;  %v1263_v22 = vpack.c.bf16 %v38_v20, %v34_v19  ;;  %1256 = vmatprep.subr.bf16.mxu0 %v1255_v17  ;;  %v1265_v24 = vpack.c.bf16 %v37_v23, %v33_v21  ;;  %v42_v26 = vld [vmem:[%s1934_s0 + $0x98] sm:$0xf]  ;;  %v17_v28 = vld [vmem:[%s1935_s1] sm:$0xff]  ;;  %v41_v29 = vld [vmem:[%s1934_s0 + $0x90] sm:$0xf] }
   0x8   :  { %v18_v30 = vld [vmem:[%s1935_s1 + $0x8] sm:$0xff]  ;;  %v19_v31 = vld [vmem:[%s1935_s1 + $0x10] sm:$0xff]  ;;  %v20_v32 = vld [vmem:[%s1935_s1 + $0x18] sm:$0xff] }
   0x9   :  { %1264 = vmatprep.subr.bf16.mxu1 %v1263_v22  ;;  %v21_v33 = vld [vmem:[%s1935_s1 + $0x20] sm:$0xff]  ;;  %v22_v34 = vld [vmem:[%s1935_s1 + $0x28] sm:$0x3f]  ;;  %vm1276_vm6 = vmpackc.low %vm298_vm2, %vm1327_vm5 }
   0xa   :  { %1258 = vmatpush1.bf16.msra.mxu0 %v1257_v18 }
   0xb   :  { %1266 = vmatpush1.bf16.msra.mxu1 %v1265_v24  ;;  %1143 = vmatprep.subr.msk.mxu0 %vm62_vm0, %v40_v25 }
   0xc   :  { %1151 = vmatprep.subr.msk.mxu1 %vm62_vm0, %v42_v26 }
   0xe   :  { %1144 = vmatpush1.msk.msra.mxu0 %vm62_vm0, %v39_v27 }
   0xf   :  { %1145 = vmatmul.mubr.msk.f32.vlgmr.msra.gmra.mrb[0].mxu0 %vm43_vm1, %v17_v28  ;;  %1152 = vmatpush1.msk.msra.mxu1 %vm62_vm0, %v41_v29 }
  0x10   :  { %1153 = vmatmul.mubr.msk.f32.vlgmr.msra.gmra.mrb[0].mxu1 %vm43_vm1, %v17_v28  ;;  %145 = vmatprep.mubr.f32.mxu0 %v1326_v3 }
  0x11   :  { %246 = vmatprep.mubr.f32.mxu1 %v1326_v3 }
  0x13   :  { %1146 = vmatmul.mubr.msk.f32.gmra.mrb[2].mxu0 %vm43_vm1, %v18_v30 }
  0x14   :  { %1154 = vmatmul.mubr.msk.f32.gmra.mrb[2].mxu1 %vm43_vm1, %v18_v30  ;;  %151 = vmatprep.mubr.f32.mxu0 %v1326_v3 }
  0x15   :  { %252 = vmatprep.mubr.f32.mxu1 %v1326_v3 }
  0x17   :  { %1147 = vmatmul.mubr.msk.f32.gmra.mrb[4].mxu0 %vm43_vm1, %v19_v31 }
  0x18   :  { %157 = vmatprep.mubr.f32.mxu0 %v1326_v3  ;;  %1155 = vmatmul.mubr.msk.f32.gmra.mrb[4].mxu1 %vm43_vm1, %v19_v31 }
  0x19   :  { %258 = vmatprep.mubr.f32.mxu1 %v1326_v3 }
  0x1b   :  { %1148 = vmatmul.mubr.msk.f32.gmra.mrb[6].mxu0 %vm43_vm1, %v20_v32 }
  0x1c   :  { %1156 = vmatmul.mubr.msk.f32.gmra.mrb[6].mxu1 %vm43_vm1, %v20_v32  ;;  %163 = vmatprep.mubr.f32.mxu0 %v1326_v3 }
  0x1d   :  { %264 = vmatprep.mubr.f32.mxu1 %v1326_v3 }
  0x1f   :  { %1149 = vmatmul.mubr.msk.f32.gmra.mrb[8].mxu0 %vm43_vm1, %v21_v33 }
  0x20   :  { %169 = vmatprep.mubr.f32.mxu0 %v1326_v3  ;;  %1157 = vmatmul.mubr.msk.f32.gmra.mrb[8].mxu1 %vm43_vm1, %v21_v33 }
  0x21   :  { %270 = vmatprep.mubr.f32.mxu1 %v1326_v3 }
  0x23   :  { %1150 = vmatmul.mubr.msk.f32.gmra.mrb[10].mxu0 %vm43_vm1, %v22_v34 }
  0x24   :  { %1158 = vmatmul.mubr.msk.f32.gmra.mrb[10].mxu1 %vm43_vm1, %v22_v34 }
  0xe2   :  { %v1458_v35 = vpop.f32.mrb[0].mxu0 }
  0xe3   :  { %v1460_v36 = vpop.f32.mrb[1].mxu0  ;;  %v1462_v37 = vpop.f32.mrb[0].mxu1  ;;  %v304_v38 = vmul.f32 %v1458_v35, %v1458_v35 }
  0xe4   :  { %v1466_v39 = vpop.f32.mrb[1].mxu1  ;;  %v283_v40 = vadd.f32 %v1460_v36, %v1458_v35  ;;  %v305_v41 = vmul.f32 %v1460_v36, %v1460_v36  ;;  %v744_v42 = vmul.f32 %v1462_v37, %v1462_v37 }
  0xe5   :  { %v724_v43 = vadd.f32 %v1466_v39, %v1462_v37  ;;  %v745_v44 = vmul.f32 %v1466_v39, %v1466_v39 }
  0xe6   :  { %284 = vadd.xlane.f32.xlu0 %v283_v40  ;;  %v316_v45 = vadd.f32 %v305_v41, %v304_v38  ;;  %v1478_v46 = vpop.f32.mrb[2].mxu0 }
  0xe7   :  { %v1480_v47 = vpop.f32.mrb[2].mxu1  ;;  %v1482_v48 = vpop.f32.mrb[3].mxu0  ;;  %v756_v49 = vadd.f32 %v745_v44, %v744_v42  ;;  %v306_v50 = vmul.f32 %v1478_v46, %v1478_v46 }
  0xe8   :  { %v1486_v51 = vpop.f32.mrb[3].mxu1  ;;  %317 = vadd.xlane.f32.xlu1 %v316_v45  ;;  %v307_v52 = vmul.f32 %v1482_v48, %v1482_v48  ;;  %v286_v53 = vadd.f32 %v1482_v48, %v1478_v46  ;;  %v746_v54 = vmul.f32 %v1480_v47, %v1480_v47 }
  0xe9   :  { %v727_v55 = vadd.f32 %v1486_v51, %v1480_v47  ;;  %v747_v56 = vmul.f32 %v1486_v51, %v1486_v51 }
  0xea   :  { %725 = vadd.xlane.f32.xlu0 %v724_v43  ;;  %v1498_v57 = vpop.f32.mrb[4].mxu0  ;;  %v319_v58 = vadd.f32 %v307_v52, %v306_v50 }
  0xeb   :  { %v1500_v59 = vpop.f32.mrb[5].mxu0  ;;  %v1502_v60 = vpop.f32.mrb[4].mxu1  ;;  %v759_v61 = vadd.f32 %v747_v56, %v746_v54  ;;  %v308_v62 = vmul.f32 %v1498_v57, %v1498_v57 }
  0xec   :  { %728 = vadd.xlane.f32.xlu1 %v727_v55  ;;  %v1506_v63 = vpop.f32.mrb[5].mxu1  ;;  %v289_v0 = vadd.f32 %v1500_v59, %v1498_v57  ;;  %v309_v1 = vmul.f32 %v1500_v59, %v1500_v59  ;;  %v748_v2 = vmul.f32 %v1502_v60, %v1502_v60 }
  0xed   :  { %v730_v3 = vadd.f32 %v1506_v63, %v1502_v60  ;;  %v749_v4 = vmul.f32 %v1506_v63, %v1506_v63 }
  0xee   :  { %757 = vadd.xlane.f32.xlu0 %v756_v49  ;;  %v1518_v5 = vpop.f32.mrb[6].mxu0  ;;  %v322_v6 = vadd.f32 %v309_v1, %v308_v62  ;;  %v336_v62 = vld [vmem:[%s1936_s2] sm:$0xff] }
  0xef   :  { %v1520_v7 = vpop.f32.mrb[7].mxu0  ;;  %v1522_v8 = vpop.f32.mrb[6].mxu1  ;;  %v310_v9 = vmul.f32 %v1518_v5, %v1518_v5  ;;  %v762_v10 = vadd.f32 %v749_v4, %v748_v2  ;;  %1221 = vmatprep.mubr.msk.f32.mxu0 %vm349_vm3, %v336_v62  ;;  %1242 = vmatprep.mubr.msk.f32.mxu1 %vm349_vm3, %v336_v62 }
  0xf0   :  { %320 = vadd.xlane.f32.xlu1 %v319_v58  ;;  %v1526_v11 = vpop.f32.mrb[7].mxu1  ;;  %v292_v12 = vadd.f32 %v1520_v7, %v1518_v5  ;;  %v311_v13 = vmul.f32 %v1520_v7, %v1520_v7  ;;  %v750_v14 = vmul.f32 %v1522_v8, %v1522_v8 }
  0xf1   :  { %v733_v15 = vadd.f32 %v1526_v11, %v1522_v8  ;;  %v751_v16 = vmul.f32 %v1526_v11, %v1526_v11 }
  0xf2   :  { %287 = vadd.xlane.f32.xlu0 %v286_v53  ;;  %v1538_v17 = vpop.f32.mrb[8].mxu0  ;;  %v325_v18 = vadd.f32 %v311_v13, %v310_v9 }
  0xf3   :  { %v1540_v19 = vpop.f32.mrb[9].mxu0  ;;  %v1542_v20 = vpop.f32.mrb[8].mxu1  ;;  %v765_v21 = vadd.f32 %v751_v16, %v750_v14  ;;  %v312_v22 = vmul.f32 %v1538_v17, %v1538_v17 }
  0xf4   :  { %760 = vadd.xlane.f32.xlu1 %v759_v61  ;;  %v1546_v23 = vpop.f32.mrb[9].mxu1  ;;  %v295_v24 = vadd.f32 %v1540_v19, %v1538_v17  ;;  %v313_v25 = vmul.f32 %v1540_v19, %v1540_v19  ;;  %v752_v26 = vmul.f32 %v1542_v20, %v1542_v20 }
  0xf5   :  { %v736_v27 = vadd.f32 %v1546_v23, %v1542_v20  ;;  %v753_v28 = vmul.f32 %v1546_v23, %v1546_v23 }
  0xf6   :  { %290 = vadd.xlane.f32.xlu0 %v289_v0  ;;  %v1558_v29 = vpop.f32.mrb[10].mxu0  ;;  %v328_v30 = vadd.f32 %v313_v25, %v312_v22 }
  0xf7   :  { %v314_v31 = vmul.f32 %v1558_v29, %v1558_v29  ;;  %v1562_v32 = vpop.f32.mrb[11].mxu0  ;;  %v1564_v33 = vpop.f32.mrb[10].mxu1  ;;  %v299_v34 = vsel %vm298_vm2, %v1558_v29, 0.0  ;;  %v768_v38 = vadd.f32 %v753_v28, %v752_v26 }
  0xf8   :  { %293 = vadd.xlane.f32.xlu1 %v292_v12  ;;  %v315_v40 = vmul.f32 %v1562_v32, %v1562_v32  ;;  %v754_v41 = vmul.f32 %v1564_v33, %v1564_v33  ;;  %v1572_v42 = vpop.f32.mrb[11].mxu1  ;;  %v300_v43 = vsel %vm298_vm2, %v1562_v32, 0.0  ;;  %v739_v44 = vsel %vm298_vm2, %v1564_v33, 0.0 }
  0xf9   :  { %1940 = vst [vmem:[#allocation2_spill] sm:$0xff] %v1572_v42  ;;  %v755_v45 = vmul.f32 %v1572_v42, %v1572_v42  ;;  %v301_v49 = vadd.f32 %v300_v43, %v299_v34  ;;  %v740_v50 = vsel %vm298_vm2, %v1572_v42, 0.0  ;;  %v331_v52 = vsel %vm298_vm2, %v314_v31, 0.0 }
  0xfa   :  { %731 = vadd.xlane.f32.xlu0 %v730_v3  ;;  %v741_v53 = vadd.f32 %v740_v50, %v739_v44  ;;  %v332_v54 = vsel %vm298_vm2, %v315_v40, 0.0  ;;  %v771_v55 = vsel %vm298_vm2, %v754_v41, 0.0 }
  0xfb   :  { %v333_v56 = vadd.f32 %v332_v54, %v331_v52  ;;  %v772_v58 = vsel %vm298_vm2, %v755_v45, 0.0 }
  0xfc   :  { %734 = vadd.xlane.f32.xlu1 %v733_v15  ;;  %v773_v61 = vadd.f32 %v772_v58, %v771_v55 }
  0xfe   :  { %323 = vadd.xlane.f32.xlu0 %v322_v6 }
 0x100   :  { %326 = vadd.xlane.f32.xlu1 %v325_v18 }
 0x102   :  { %763 = vadd.xlane.f32.xlu0 %v762_v10 }
 0x104   :  { %766 = vadd.xlane.f32.xlu1 %v765_v21 }
 0x106   :  { %296 = vadd.xlane.f32.xlu0 %v295_v24 }
 0x108   :  { %302 = vadd.xlane.f32.xlu1 %v301_v49 }
 0x10a   :  { %737 = vadd.xlane.f32.xlu0 %v736_v27 }
 0x10c   :  { %742 = vadd.xlane.f32.xlu1 %v741_v53 }
 0x10e   :  { %329 = vadd.xlane.f32.xlu0 %v328_v30 }
 0x110   :  { %334 = vadd.xlane.f32.xlu1 %v333_v56 }
 0x112   :  { %769 = vadd.xlane.f32.xlu0 %v768_v38 }
 0x114   :  { %774 = vadd.xlane.f32.xlu1 %v773_v61 }
 0x173   :  { %v285_v0 = vpop.xlane.xlu0 %284 }
 0x175   :  { %v318_v1 = vpop.xlane.xlu1 %317 }
 0x176   :  { %v343_v10 = vsel %vm342_vm4, %v285_v0, %v318_v1  ;;  %v337_v1 = vld [vmem:[%s1936_s2 + $0x8] sm:$0xff] }
 0x177   :  { %v726_v2 = vpop.xlane.xlu0 %725 }
 0x179   :  { %v729_v3 = vpop.xlane.xlu1 %728 }
 0x17b   :  { %v758_v4 = vpop.xlane.xlu0 %757 }
 0x17c   :  { %v782_v15 = vsel %vm342_vm4, %v726_v2, %v758_v4  ;;  %v339_v4 = vld [vmem:[%s1936_s2 + $0x18] sm:$0xff] }
 0x17d   :  { %v321_v6 = vpop.xlane.xlu1 %320 }
 0x17f   :  { %v288_v9 = vpop.xlane.xlu0 %287 }
 0x180   :  { %v344_v12 = vsel %vm342_vm4, %v288_v9, %v321_v6  ;;  %v340_v6 = vld [vmem:[%s1936_s2 + $0x20] sm:$0xff]  ;;  %v341_v9 = vld [vmem:[%s1936_s2 + $0x28] sm:$0x3f] }
 0x181   :  { %v1267_v13 = vpack.c.bf16 %v344_v12, %v343_v10  ;;  %v761_v14 = vpop.xlane.xlu1 %760  ;;  %v781_v10 = vld [vmem:[%s1936_s2 + $0x28] sm:$0x3f] }
 0x182   :  { %v783_v16 = vsel %vm342_vm4, %v729_v3, %v761_v14  ;;  %v338_v3 = vld [vmem:[%s1936_s2 + $0x10] sm:$0xff] }
 0x183   :  { %v1281_v18 = vpack.c.bf16 %v783_v16, %v782_v15  ;;  %1268 = vmatprep.subr.bf16.mxu0 %v1267_v13  ;;  %v291_v21 = vpop.xlane.xlu0 %290 }
 0x184   :  { %1270 = vmatpush3.bf16.msra.mxu0 %v1267_v13 }
 0x185   :  { %1282 = vmatprep.subr.bf16.mxu1 %v1281_v18  ;;  %v294_v22 = vpop.xlane.xlu1 %293 }
 0x186   :  { %1284 = vmatpush3.bf16.msra.mxu1 %v1281_v18 }
 0x187   :  { %v732_v24 = vpop.xlane.xlu0 %731 }
 0x189   :  { %v735_v25 = vpop.xlane.xlu1 %734 }
 0x18b   :  { %v324_v26 = vpop.xlane.xlu0 %323 }
 0x18c   :  { %v345_v28 = vsel %vm342_vm4, %v291_v21, %v324_v26 }
 0x18d   :  { %v327_v27 = vpop.xlane.xlu1 %326 }
 0x18e   :  { %v346_v30 = vsel %vm342_vm4, %v294_v22, %v327_v27 }
 0x18f   :  { %v1271_v31 = vpack.c.bf16 %v346_v30, %v345_v28  ;;  %v764_v34 = vpop.xlane.xlu0 %763 }
 0x190   :  { %v784_v40 = vsel %vm342_vm4, %v732_v24, %v764_v34 }
 0x191   :  { %1272 = vmatprep.subr.bf16.mxu0 %v1271_v31  ;;  %v767_v38 = vpop.xlane.xlu1 %766 }
 0x192   :  { %v785_v41 = vsel %vm342_vm4, %v735_v25, %v767_v38  ;;  %1274 = vmatpush3.bf16.msra.mxu0 %v1271_v31 }
 0x193   :  { %v1285_v43 = vpack.c.bf16 %v785_v41, %v784_v40  ;;  %v297_v44 = vpop.xlane.xlu0 %296 }
 0x195   :  { %1286 = vmatprep.subr.bf16.mxu1 %v1285_v43  ;;  %v303_v45 = vpop.xlane.xlu1 %302 }
 0x196   :  { %1288 = vmatpush3.bf16.msra.mxu1 %v1285_v43 }
 0x197   :  { %v738_v49 = vpop.xlane.xlu0 %737 }
 0x199   :  { %v743_v50 = vpop.xlane.xlu1 %742 }
 0x19b   :  { %v330_v52 = vpop.xlane.xlu0 %329 }
 0x19c   :  { %v347_v54 = vsel %vm342_vm4, %v297_v44, %v330_v52 }
 0x19d   :  { %v335_v53 = vpop.xlane.xlu1 %334 }
 0x19e   :  { %v348_v55 = vsel %vm342_vm4, %v303_v45, %v335_v53  ;;  %v1701_v53 = vld [vmem:[%s1937_s3 + $0x10] sm:$0xff] }
 0x19f   :  { %v1275_v56 = vpack.c.bf16 %v348_v55, %v347_v54  ;;  %v770_v58 = vpop.xlane.xlu0 %769  ;;  %v1709_v54 = vld [vmem:[%s1937_s3 + $0x8] sm:$0xff]  ;;  %v1714_v55 = vld [vmem:[%s1937_s3 + $0x20] sm:$0xff] }
 0x1a0   :  { %v786_v62 = vsel %vm342_vm4, %v738_v49, %v770_v58  ;;  %v1730_v58 = vld [vmem:[%s1937_s3 + $0x28] sm:$0x3f] }
 0x1a1   :  { %1277 = vmatprep.subr.msk.bf16.mxu0 %vm1276_vm6, %v1275_v56  ;;  %v775_v61 = vpop.xlane.xlu1 %774 }
 0x1a2   :  { %v787_v0 = vsel %vm342_vm4, %v743_v50, %v775_v61  ;;  %1280 = vmatpush3.bf16.msk.msra.mxu0 %vm1276_vm6, %v1275_v56  ;;  %v1691_v50 = vld [vmem:[%s1937_s3] sm:$0xff]  ;;  %v1723_v56 = vld [vmem:[%s1937_s3 + $0x18] sm:$0xff]  ;;  %s1329_s3 = smov 127  }
 0x1a3   :  { %v1289_v2 = vpack.c.bf16 %v787_v0, %v786_v62 }
 0x1a5   :  { %1222 = vmatmul.mubr.msk.f32.vlgmr.msra.gmra.mrb[12].mxu0 %vm349_vm3, %v337_v1  ;;  %1291 = vmatprep.subr.msk.bf16.mxu1 %vm1276_vm6, %v1289_v2 }
 0x1a6   :  { %1294 = vmatpush3.bf16.msk.msra.mxu1 %vm1276_vm6, %v1289_v2  ;;  %1224 = vmatprep.mubr.msk.f32.mxu0 %vm349_vm3, %v338_v3 }
 0x1a9   :  { %1243 = vmatmul.mubr.msk.f32.vlgmr.msra.gmra.mrb[12].mxu1 %vm349_vm3, %v337_v1  ;;  %1225 = vmatmul.mubr.msk.f32.gmra.mrb[14].mxu0 %vm349_vm3, %v339_v4 }
 0x1aa   :  { %1245 = vmatprep.mubr.msk.f32.mxu1 %vm349_vm3, %v338_v3  ;;  %1227 = vmatprep.mubr.msk.f32.mxu0 %vm349_vm3, %v340_v6 }
 0x1ad   :  { %1246 = vmatmul.mubr.msk.f32.gmra.mrb[14].mxu1 %vm349_vm3, %v339_v4  ;;  %1228 = vmatmul.mubr.msk.f32.gmra.mrb[16].mxu0 %vm349_vm3, %v341_v9 }
 0x1ae   :  { %1248 = vmatprep.mubr.msk.f32.mxu1 %vm349_vm3, %v340_v6 }
 0x1b1   :  { %1249 = vmatmul.mubr.msk.f32.gmra.mrb[16].mxu1 %vm349_vm3, %v781_v10 }
 0x278   :  { %v1632_v12 = vpop.f32.mrb[12].mxu0 }
 0x279   :  { %v467_v13 = vmul.f32 %v1632_v12, %v1632_v12  ;;  %v1636_v14 = vpop.f32.mrb[13].mxu0 }
 0x27a   :  { %v466_v15 = vmul.f32 %v1636_v14, %v1636_v14 }
 0x27b   :  { %480 = vrot.lane.b32.xlu1 %v467_v13, %s1328_s27 }
 0x27c   :  { %478 = vrot.lane.b32.xlu0 %v466_v15, %s1328_s27  ;;  %v1642_v16 = vpop.f32.mrb[12].mxu1  ;;  %v1644_v18 = vpop.f32.mrb[14].mxu0 }
 0x27d   :  { %v905_v21 = vmul.f32 %v1642_v16, %v1642_v16  ;;  %v1648_v22 = vpop.f32.mrb[13].mxu1  ;;  %v1650_v24 = vpop.f32.mrb[15].mxu0  ;;  %v469_v26 = vmul.f32 %v1644_v18, %v1644_v18 }
 0x27e   :  { %v904_v25 = vmul.f32 %v1648_v22, %v1648_v22  ;;  %v468_v45 = vmul.f32 %v1650_v24, %v1650_v24 }
 0x27f   :  { %918 = vrot.lane.b32.xlu1 %v905_v21, %s1328_s27 }
 0x280   :  { %916 = vrot.lane.b32.xlu0 %v904_v25, %s1328_s27  ;;  %v1658_v27 = vpop.f32.mrb[14].mxu1  ;;  %v1660_v28 = vpop.f32.mrb[16].mxu0 }
 0x281   :  { %v1662_v30 = vpop.f32.mrb[15].mxu1  ;;  %v1664_v31 = vpop.f32.mrb[17].mxu0  ;;  %v907_v38 = vmul.f32 %v1658_v27, %v1658_v27  ;;  %v471_v49 = vmul.f32 %v1660_v28, %v1660_v28 }
 0x282   :  { %v906_v34 = vmul.f32 %v1662_v30, %v1662_v30  ;;  %v470_v40 = vmul.f32 %v1664_v31, %v1664_v31 }
 0x283   :  { %484 = vrot.lane.b32.xlu1 %v469_v26, %s1328_s27 }
 0x284   :  { %920 = vrot.lane.b32.xlu0 %v906_v34, %s1328_s27  ;;  %v1674_v41 = vpop.f32.mrb[16].mxu1 }
 0x285   :  { %v1676_v43 = vpop.f32.mrb[17].mxu1  ;;  %v909_v52 = vmul.f32 %v1674_v41, %v1674_v41 }
 0x286   :  { %v908_v44 = vmul.f32 %v1676_v43, %v1676_v43 }
 0x287   :  { %922 = vrot.lane.b32.xlu1 %v907_v38, %s1328_s27 }
 0x288   :  { %486 = vrot.lane.b32.xlu0 %v470_v40, %s1328_s27 }
 0x28b   :  { %482 = vrot.lane.b32.xlu1 %v468_v45, %s1328_s27 }
 0x28c   :  { %924 = vrot.lane.b32.xlu0 %v908_v44, %s1328_s27 }
 0x28f   :  { %488 = vrot.lane.b32.xlu1 %v471_v49, %s1328_s27 }
 0x290   :  { %526 = vrot.lane.b32.xlu0 %v1691_v50, %s1328_s27 }
 0x293   :  { %926 = vrot.lane.b32.xlu1 %v909_v52, %s1328_s27 }
 0x294   :  { %530 = vrot.lane.b32.xlu0 %v1701_v53, %s1328_s27 }
 0x297   :  { %528 = vrot.lane.b32.xlu1 %v1709_v54, %s1328_s27 }
 0x298   :  { %534 = vrot.lane.b32.xlu0 %v1714_v55, %s1328_s27 }
 0x29b   :  { %532 = vrot.lane.b32.xlu1 %v1723_v56, %s1328_s27 }
 0x29f   :  { %536 = vrot.lane.b32.xlu1 %v1730_v58, %s1328_s27 }
 0x2ed   :  { %v481_v61 = vpop.permute.xlu1 %480 }
 0x2ee   :  { %v479_v62 = vpop.permute.xlu0 %478  ;;  %v497_v4 = vsub.f32 %v1632_v12, %v481_v61 }
 0x2ef   :  { %v496_v0 = vsub.f32 %v1636_v14, %v479_v62 }
 0x2f0   :  { %v503_v21 = vmax.f32 %v497_v4, 0.0 }
 0x2f1   :  { %v502_v1 = vmax.f32 %v496_v0, 0.0  ;;  %v919_v2 = vpop.permute.xlu1 %918 }
 0x2f2   :  { %v917_v3 = vpop.permute.xlu0 %916  ;;  %v935_v25 = vsub.f32 %v1642_v16, %v919_v2  ;;  %v509_v44 = vadd.f32 1e-06, %v503_v21 }
 0x2f3   :  { %v934_v6 = vsub.f32 %v1648_v22, %v917_v3  ;;  %v508_v9 = vadd.f32 1e-06, %v502_v1 }
 0x2f4   :  { %v941_v45 = vmax.f32 %v935_v25, 0.0 }
 0x2f5   :  { %v940_v10 = vmax.f32 %v934_v6, 0.0  ;;  %v485_v13 = vpop.permute.xlu1 %484  ;;  %1302 = vrsqrt.f32 %v508_v9 }
 0x2f6   :  { %v921_v15 = vpop.permute.xlu0 %920  ;;  %v499_v49 = vsub.f32 %v1644_v18, %v485_v13  ;;  %v947_v2 = vadd.f32 1e-06, %v941_v45 }
 0x2f7   :  { %v946_v26 = vadd.f32 1e-06, %v940_v10  ;;  %v936_v34 = vsub.f32 %v1662_v30, %v921_v15 }
 0x2f8   :  { %v505_v3 = vmax.f32 %v499_v49, 0.0 }
 0x2f9   :  { %v923_v38 = vpop.permute.xlu1 %922  ;;  %1304 = vrsqrt.f32 %v946_v26  ;;  %v942_v52 = vmax.f32 %v936_v34, 0.0 }
 0x2fa   :  { %v487_v40 = vpop.permute.xlu0 %486  ;;  %1306 = vrsqrt.f32 %v509_v44  ;;  %v937_v4 = vsub.f32 %v1658_v27, %v923_v38 }
 0x2fb   :  { %v500_v62 = vsub.f32 %v1664_v31, %v487_v40  ;;  %v948_v9 = vadd.f32 1e-06, %v942_v52  ;;  %1308 = vrsqrt.f32 %v947_v2  ;;  %v511_v40 = vadd.f32 1e-06, %v505_v3 }
 0x2fd   :  { %v483_v61 = vpop.permute.xlu1 %482  ;;  %v506_v21 = vmax.f32 %v500_v62, 0.0 }
 0x2fe   :  { %v498_v0 = vsub.f32 %v1650_v24, %v483_v61  ;;  %v925_v1 = vpop.permute.xlu0 %924  ;;  %v943_v61 = vmax.f32 %v937_v4, 0.0 }
 0x2ff   :  { %v1303_v15 = vpop.eup %1302  ;;  %v938_v13 = vsub.f32 %v1676_v43, %v925_v1  ;;  %v512_v49 = vadd.f32 1e-06, %v506_v21 }
 0x300   :  { %v504_v6 = vmax.f32 %v498_v0, 0.0  ;;  %v949_v0 = vadd.f32 1e-06, %v943_v61 }
 0x301   :  { %v489_v10 = vpop.permute.xlu1 %488  ;;  %v944_v52 = vmax.f32 %v938_v13, 0.0 }
 0x302   :  { %v510_v25 = vadd.f32 1e-06, %v504_v6  ;;  %v501_v26 = vsub.f32 %v1660_v28, %v489_v10  ;;  %v527_v34 = vpop.permute.xlu0 %526 }
 0x303   :  { %v1745_v42 = vmul.f32 %v1303_v15, %v527_v34  ;;  %v1305_v44 = vpop.eup %1304  ;;  %v950_v10 = vadd.f32 1e-06, %v944_v52 }
 0x304   :  { %1310 = vrsqrt.f32 %v510_v25  ;;  %v507_v45 = vmax.f32 %v501_v26, 0.0  ;;  %v1750_v1 = vmul.f32 %v1305_v44, %v527_v34  ;;  %v1307_v2 = vpop.eup %1306 }
 0x305   :  { %556 = vrot.lane.b32.xlu0 %v1745_v42, %s1329_s3  ;;  %v927_v38 = vpop.permute.xlu1 %926  ;;  %1312 = vrsqrt.f32 %v948_v9  ;;  %v1309_v9 = vpop.eup %1308 }
 0x306   :  { %v939_v62 = vsub.f32 %v1674_v41, %v927_v38  ;;  %1314 = vrsqrt.f32 %v511_v40  ;;  %v513_v3 = vadd.f32 1e-06, %v507_v45  ;;  %v531_v13 = vpop.permute.xlu0 %530 }
 0x307   :  { %1316 = vrsqrt.f32 %v512_v49 }
 0x308   :  { %v945_v4 = vmax.f32 %v939_v62, 0.0  ;;  %1318 = vrsqrt.f32 %v949_v0  ;;  %v1330_v62 = vmov 1  }
 0x309   :  { %970 = vrot.lane.b32.xlu0 %v1750_v1, %s1329_s3  ;;  %v529_v6 = vpop.permute.xlu1 %528  ;;  %1320 = vrsqrt.f32 %v513_v3  ;;  %1301 = vset.pattern.permute.xlu1 %v1330_v62 }
 0x30a   :  { %v1754_v15 = vmul.f32 %v1307_v2, %v529_v6  ;;  %v951_v21 = vadd.f32 1e-06, %v945_v4  ;;  %1322 = vrsqrt.f32 %v950_v10  ;;  %v1758_v26 = vmul.f32 %v1309_v9, %v529_v6  ;;  %v535_v52 = vpop.permute.xlu0 %534  ;;  %1300 = vset.pattern.permute.xlu0 %v1330_v62 }
 0x30c   :  { %558 = vrot.lane.b32.xlu1 %v1754_v15, %s1329_s3  ;;  %1324 = vrsqrt.f32 %v951_v21 }
 0x30d   :  { %v533_v40 = vpop.permute.xlu1 %532 }
 0x30e   :  { %v1311_v25 = vpop.eup %1310 }
 0x30f   :  { %v1760_v34 = vmul.f32 %v1311_v25, %v531_v13  ;;  %v1313_v61 = vpop.eup %1312 }
 0x310   :  { %972 = vrot.lane.b32.xlu1 %v1758_v26, %s1329_s3  ;;  %v1315_v44 = vpop.eup %1314  ;;  %v1766_v38 = vmul.f32 %v1313_v61, %v531_v13 }
 0x311   :  { %560 = vrot.lane.b32.xlu0 %v1760_v34, %s1329_s3  ;;  %v547_v45 = vmul.f32 %v1315_v44, %v533_v40  ;;  %v1317_v49 = vpop.eup %1316  ;;  %v537_v6 = vpop.permute.xlu1 %536 }
 0x312   :  { %v1319_v0 = vpop.eup %1318  ;;  %v548_v4 = vmul.f32 %v1317_v49, %v535_v52 }
 0x313   :  { %v961_v2 = vmul.f32 %v1319_v0, %v533_v40  ;;  %v1321_v3 = vpop.eup %1320 }
 0x314   :  { %562 = vrot.lane.b32.xlu1 %v547_v45, %s1329_s3  ;;  %v1323_v10 = vpop.eup %1322  ;;  %v549_v9 = vmul.f32 %v1321_v3, %v537_v6 }
 0x315   :  { %974 = vrot.lane.b32.xlu0 %v1766_v38, %s1329_s3  ;;  %v962_v25 = vmul.f32 %v1323_v10, %v535_v52 }
 0x316   :  { %v1325_v21 = vpop.eup %1324 }
 0x317   :  { %v963_v13 = vmul.f32 %v1325_v21, %v537_v6 }
 0x318   :  { %976 = vrot.lane.b32.xlu1 %v961_v2, %s1329_s3 }
 0x319   :  { %564 = vrot.lane.b32.xlu0 %v548_v4, %s1329_s3 }
 0x31c   :  { %566 = vrot.lane.b32.xlu1 %v549_v9, %s1329_s3 }
 0x31d   :  { %978 = vrot.lane.b32.xlu0 %v962_v25, %s1329_s3 }
 0x320   :  { %980 = vrot.lane.b32.xlu1 %v963_v13, %s1329_s3 }
 0x377   :  { %v557_v61 = vpop.permute.xlu0 %556 }
 0x378   :  { %v574_v40 = vmul.f32 %v557_v61, %v1636_v14 }
 0x37a   :  { %586 = vrot.lane.b32.xlu0 %v574_v40, %s1328_s27 }
 0x37b   :  { %v971_v44 = vpop.permute.xlu0 %970 }
 0x37c   :  { %v988_v49 = vmul.f32 %v971_v44, %v1648_v22 }
 0x37e   :  { %1000 = vrot.lane.b32.xlu0 %v988_v49, %s1328_s27  ;;  %v559_v62 = vpop.permute.xlu1 %558 }
 0x37f   :  { %v575_v52 = vmul.f32 %v1632_v12, %v559_v62 }
 0x381   :  { %588 = vrot.lane.b32.xlu1 %v575_v52, %s1328_s27 }
 0x382   :  { %v973_v0 = vpop.permute.xlu1 %972 }
 0x383   :  { %v989_v3 = vmul.f32 %v1642_v16, %v973_v0  ;;  %v561_v6 = vpop.permute.xlu0 %560 }
 0x384   :  { %v576_v10 = vmul.f32 %v561_v6, %v1650_v24 }
 0x385   :  { %1002 = vrot.lane.b32.xlu1 %v989_v3, %s1328_s27 }
 0x386   :  { %590 = vrot.lane.b32.xlu0 %v576_v10, %s1328_s27  ;;  %v563_v14 = vpop.permute.xlu1 %562 }
 0x387   :  { %v577_v22 = vmul.f32 %v1644_v18, %v563_v14  ;;  %v975_v21 = vpop.permute.xlu0 %974 }
 0x388   :  { %v990_v61 = vmul.f32 %v975_v21, %v1662_v30 }
 0x389   :  { %592 = vrot.lane.b32.xlu1 %v577_v22, %s1328_s27 }
 0x38a   :  { %1004 = vrot.lane.b32.xlu0 %v990_v61, %s1328_s27  ;;  %v977_v12 = vpop.permute.xlu1 %976 }
 0x38b   :  { %v991_v16 = vmul.f32 %v1658_v27, %v977_v12  ;;  %v565_v40 = vpop.permute.xlu0 %564 }
 0x38c   :  { %v578_v24 = vmul.f32 %v565_v40, %v1664_v31 }
 0x38d   :  { %1006 = vrot.lane.b32.xlu1 %v991_v16, %s1328_s27 }
 0x38e   :  { %594 = vrot.lane.b32.xlu0 %v578_v24, %s1328_s27  ;;  %v567_v44 = vpop.permute.xlu1 %566 }
 0x38f   :  { %v579_v18 = vmul.f32 %v1660_v28, %v567_v44  ;;  %v979_v49 = vpop.permute.xlu0 %978 }
 0x390   :  { %v992_v30 = vmul.f32 %v979_v49, %v1676_v43 }
 0x391   :  { %596 = vrot.lane.b32.xlu1 %v579_v18, %s1328_s27 }
 0x392   :  { %1008 = vrot.lane.b32.xlu0 %v992_v30, %s1328_s27  ;;  %v981_v62 = vpop.permute.xlu1 %980 }
 0x393   :  { %v993_v27 = vmul.f32 %v1674_v41, %v981_v62 }
 0x395   :  { %1010 = vrot.lane.b32.xlu1 %v993_v27, %s1328_s27 }
 0x396   :  { %611 = vperm.xlu0 %1300, %v1745_v42  }
 0x399   :  { %615 = vperm.xlu1 %1301, %v1754_v15  }
 0x39a   :  { %623 = vperm.xlu0 %1300, %v547_v45  }
 0x39d   :  { %619 = vperm.xlu1 %1301, %v1760_v34  }
 0x39e   :  { %631 = vperm.xlu0 %1300, %v549_v9  }
 0x3a1   :  { %627 = vperm.xlu1 %1301, %v548_v4  }
 0x3a2   :  { %1029 = vperm.xlu0 %1300, %v1758_v26  }
 0x3a5   :  { %1025 = vperm.xlu1 %1301, %v1750_v1  }
 0x3a6   :  { %1037 = vperm.xlu0 %1300, %v961_v2  }
 0x3a9   :  { %1033 = vperm.xlu1 %1301, %v1766_v38  }
 0x3aa   :  { %1045 = vperm.xlu0 %1300, %v963_v13  }
 0x3ad   :  { %1041 = vperm.xlu1 %1301, %v962_v25  }
 0x3ec   :  { %v587_v28 = vpop.permute.xlu0 %586 }
 0x3ed   :  { %v604_v31 = vsub.f32 %v1691_v50, %v587_v28 }
 0x3ef   :  { %648 = vperm.xlu1 %1301, %v604_v31  }
 0x3f0   :  { %v1001_v42 = vpop.permute.xlu0 %1000 }
 0x3f1   :  { %v1018_v41 = vsub.f32 %v1691_v50, %v1001_v42 }
 0x3f3   :  { %1062 = vperm.xlu1 %1301, %v1018_v41   ;;  %v589_v43 = vpop.permute.xlu1 %588 }
 0x3f4   :  { %v605_v15 = vsub.f32 %v1709_v54, %v589_v43 }
 0x3f6   :  { %653 = vperm.xlu0 %1300, %v605_v15  }
 0x3f7   :  { %v1003_v26 = vpop.permute.xlu1 %1002 }
 0x3f8   :  { %v1019_v1 = vsub.f32 %v1709_v54, %v1003_v26  ;;  %v591_v34 = vpop.permute.xlu0 %590 }
 0x3f9   :  { %v606_v45 = vsub.f32 %v1701_v53, %v591_v34 }
 0x3fa   :  { %1067 = vperm.xlu0 %1300, %v1019_v1  }
 0x3fb   :  { %658 = vperm.xlu1 %1301, %v606_v45   ;;  %v593_v38 = vpop.permute.xlu1 %592 }
 0x3fc   :  { %v607_v2 = vsub.f32 %v1723_v56, %v593_v38  ;;  %v1005_v4 = vpop.permute.xlu0 %1004 }
 0x3fd   :  { %v1020_v9 = vsub.f32 %v1701_v53, %v1005_v4 }
 0x3fe   :  { %663 = vperm.xlu0 %1300, %v607_v2  }
 0x3ff   :  { %1072 = vperm.xlu1 %1301, %v1020_v9   ;;  %v1007_v50 = vpop.permute.xlu1 %1006 }
 0x400   :  { %v1021_v25 = vsub.f32 %v1723_v56, %v1007_v50  ;;  %v595_v13 = vpop.permute.xlu0 %594 }
 0x401   :  { %v608_v52 = vsub.f32 %v1714_v55, %v595_v13 }
 0x402   :  { %1077 = vperm.xlu0 %1300, %v1021_v25  }
 0x403   :  { %668 = vperm.xlu1 %1301, %v608_v52   ;;  %v597_v54 = vpop.permute.xlu1 %596 }
 0x404   :  { %v609_v0 = vsub.f32 %v1730_v58, %v597_v54  ;;  %v1009_v3 = vpop.permute.xlu0 %1008 }
 0x405   :  { %v1022_v6 = vsub.f32 %v1714_v55, %v1009_v3 }
 0x406   :  { %673 = vperm.xlu0 %1300, %v609_v0  }
 0x407   :  { %1082 = vperm.xlu1 %1301, %v1022_v6   ;;  %v1011_v10 = vpop.permute.xlu1 %1010 }
 0x408   :  { %v1023_v53 = vsub.f32 %v1730_v58, %v1011_v10 }
 0x40a   :  { %1087 = vperm.xlu0 %1300, %v1023_v53  }
 0x415   :  { %v612_v56 = vpop.permute.xlu0 %611 }
 0x416   :  { %v634_v18 = vmul.f32 %v612_v56, %v1458_v35  ;;  %v635_v58 = vmul.f32 %v612_v56, %v1460_v36 }
 0x418   :  { %v616_v14 = vpop.permute.xlu1 %615 }
 0x419   :  { %v624_v61 = vpop.permute.xlu0 %623  ;;  %v636_v35 = vmul.f32 %v616_v14, %v1478_v46  ;;  %v637_v36 = vmul.f32 %v616_v14, %v1482_v48 }
 0x41c   :  { %v620_v22 = vpop.permute.xlu1 %619 }
 0x41d   :  { %v1820_v16 = vpop.permute.xlu0 %631  ;;  %v638_v13 = vmul.f32 %v620_v22, %v1498_v57  ;;  %v639_v52 = vmul.f32 %v620_v22, %v1500_v59  ;;  %v640_v57 = vmul.f32 %v624_v61, %v1518_v5  ;;  %v641_v59 = vmul.f32 %v624_v61, %v1520_v7 }
 0x420   :  { %v1818_v21 = vpop.permute.xlu1 %627 }
 0x421   :  { %v1030_v24 = vpop.permute.xlu0 %1029 }
 0x422   :  { %v1050_v50 = vmul.f32 %v1030_v24, %v1480_v47  ;;  %v1051_v46 = vmul.f32 %v1030_v24, %v1486_v51 }
 0x424   :  { %v1026_v12 = vpop.permute.xlu1 %1025 }
 0x425   :  { %v1824_v55 = vpop.permute.xlu0 %1037  ;;  %v1048_v27 = vmul.f32 %v1026_v12, %v1462_v37  ;;  %v1049_v28 = vmul.f32 %v1026_v12, %v1466_v39 }
 0x428   :  { %v1034_v40 = vpop.permute.xlu1 %1033 }
 0x429   :  { %v1830_v31 = vpop.permute.xlu0 %1045  ;;  %v1052_v56 = vmul.f32 %v1034_v40, %v1502_v60  ;;  %v1053_v12 = vmul.f32 %v1034_v40, %v1506_v63  ;;  %v1055_v60 = vmul.f32 %v1824_v55, %v1526_v11 }
 0x42c   :  { %v1822_v44 = vpop.permute.xlu1 %1041 }
 0x46e   :  { %v649_v49 = vpop.permute.xlu1 %648 }
 0x46f   :  { %v676_v30 = vadd.f32 %v649_v49, %v634_v18  ;;  %v677_v62 = vadd.f32 %v649_v49, %v635_v58 }
 0x471   :  { %v688_v42 = vmul.f32 0.01, %v676_v30  ;;  %v689_v41 = vmul.f32 0.01, %v677_v62 }
 0x472   :  { %v1063_v43 = vpop.permute.xlu1 %1062 }
 0x473   :  { %v700_v15 = vmax.f32 %v676_v30, %v688_v42  ;;  %v701_v26 = vmax.f32 %v677_v62, %v689_v41  ;;  %v1090_v1 = vadd.f32 %v1063_v43, %v1048_v27  ;;  %v1091_v34 = vadd.f32 %v1063_v43, %v1049_v28 }
 0x474   :  { %v1054_v41 = vmul.f32 %v1824_v55, %v1522_v8  ;;  %v642_v43 = vmul.f32 %v1818_v21, %v1538_v17 }
 0x475   :  { %712 = vst [vmem:[%s1938_s4] sm:$0xff] %v700_v15  ;;  %713 = vst [vmem:[%s1938_s4 + $0x8] sm:$0xff] %v701_v26  ;;  %v1102_v37 = vmul.f32 0.01, %v1090_v1  ;;  %v1103_v39 = vmul.f32 0.01, %v1091_v34  ;;  %v654_v45 = vpop.permute.xlu0 %653  ;;  %v643_v15 = vmul.f32 %v1818_v21, %v1540_v19  ;;  %v644_v21 = vmul.f32 %v1820_v16, %v1558_v29 }
 0x476   :  { %v678_v38 = vadd.f32 %v654_v45, %v636_v35  ;;  %v679_v2 = vadd.f32 %v654_v45, %v637_v36  ;;  %v645_v45 = vmul.f32 %v1820_v16, %v1562_v32 }
 0x477   :  { %v1114_v4 = vmax.f32 %v1090_v1, %v1102_v37  ;;  %v1115_v9 = vmax.f32 %v1091_v34, %v1103_v39 }
 0x478   :  { %v690_v48 = vmul.f32 0.01, %v678_v38  ;;  %v691_v25 = vmul.f32 0.01, %v679_v2 }
 0x479   :  { %1173 = vst [vmem:[%s1938_s4 + $0x60] sm:$0xff] %v1114_v4  ;;  %1174 = vst [vmem:[%s1938_s4 + $0x68] sm:$0xff] %v1115_v9  ;;  %v1068_v54 = vpop.permute.xlu0 %1067  ;;  %v1056_v4 = vmul.f32 %v1822_v44, %v1542_v20  ;;  %v1057_v9 = vmul.f32 %v1822_v44, %v1546_v23  ;;  %v1058_v44 = vmul.f32 %v1830_v31, %v1564_v33 }
 0x47a   :  { %v702_v0 = vmax.f32 %v678_v38, %v690_v48  ;;  %v703_v3 = vmax.f32 %v679_v2, %v691_v25  ;;  %v1092_v47 = vadd.f32 %v1068_v54, %v1050_v50  ;;  %v1093_v6 = vadd.f32 %v1068_v54, %v1051_v46  ;;  %v659_v51 = vpop.permute.xlu1 %658 }
 0x47b   :  { %v680_v10 = vadd.f32 %v659_v51, %v638_v13  ;;  %v681_v53 = vadd.f32 %v659_v51, %v639_v52 }
 0x47c   :  { %714 = vst [vmem:[%s1938_s4 + $0x10] sm:$0xff] %v702_v0  ;;  %715 = vst [vmem:[%s1938_s4 + $0x18] sm:$0xff] %v703_v3  ;;  %v1104_v14 = vmul.f32 0.01, %v1092_v47  ;;  %v1105_v22 = vmul.f32 0.01, %v1093_v6 }
 0x47d   :  { %v692_v24 = vmul.f32 0.01, %v680_v10  ;;  %v693_v18 = vmul.f32 0.01, %v681_v53  ;;  %v664_v58 = vpop.permute.xlu0 %663  ;;  %v1941_v0 = vld [vmem:[#allocation2_spill] sm:$0xff] }
 0x47e   :  { %v1116_v5 = vmax.f32 %v1092_v47, %v1104_v14  ;;  %v1117_v49 = vmax.f32 %v1093_v6, %v1105_v22  ;;  %v682_v7 = vadd.f32 %v664_v58, %v640_v57  ;;  %v683_v61 = vadd.f32 %v664_v58, %v641_v59  ;;  %v1073_v30 = vpop.permute.xlu1 %1072 }
 0x47f   :  { %v704_v62 = vmax.f32 %v680_v10, %v692_v24  ;;  %v705_v27 = vmax.f32 %v681_v53, %v693_v18  ;;  %v1094_v28 = vadd.f32 %v1073_v30, %v1052_v56  ;;  %v1095_v42 = vadd.f32 %v1073_v30, %v1053_v12 }
 0x480   :  { %1175 = vst [vmem:[%s1938_s4 + $0x70] sm:$0xff] %v1116_v5  ;;  %1176 = vst [vmem:[%s1938_s4 + $0x78] sm:$0xff] %v1117_v49  ;;  %v694_v63 = vmul.f32 0.01, %v682_v7  ;;  %v695_v40 = vmul.f32 0.01, %v683_v61  ;;  %v1059_v3 = vmul.f32 %v1830_v31, %v1941_v0 }
 0x481   :  { %716 = vst [vmem:[%s1938_s4 + $0x20] sm:$0xff] %v704_v62  ;;  %717 = vst [vmem:[%s1938_s4 + $0x28] sm:$0xff] %v705_v27  ;;  %v1106_v8 = vmul.f32 0.01, %v1094_v28  ;;  %v1107_v11 = vmul.f32 0.01, %v1095_v42  ;;  %v1078_v55 = vpop.permute.xlu0 %1077 }
 0x482   :  { %v706_v26 = vmax.f32 %v682_v7, %v694_v63  ;;  %v707_v1 = vmax.f32 %v683_v61, %v695_v40  ;;  %v1096_v34 = vadd.f32 %v1078_v55, %v1054_v41  ;;  %v1097_v35 = vadd.f32 %v1078_v55, %v1055_v60  ;;  %v669_v36 = vpop.permute.xlu1 %668 }
 0x483   :  { %v1118_v17 = vmax.f32 %v1094_v28, %v1106_v8  ;;  %v1119_v37 = vmax.f32 %v1095_v42, %v1107_v11  ;;  %v684_v39 = vadd.f32 %v669_v36, %v642_v43  ;;  %v685_v19 = vadd.f32 %v669_v36, %v643_v15 }
 0x484   :  { %718 = vst [vmem:[%s1938_s4 + $0x30] sm:$0xff] %v706_v26  ;;  %719 = vst [vmem:[%s1938_s4 + $0x38] sm:$0xff] %v707_v1  ;;  %v1108_v38 = vmul.f32 0.01, %v1096_v34  ;;  %v1109_v2 = vmul.f32 0.01, %v1097_v35 }
 0x485   :  { %1177 = vst [vmem:[%s1938_s4 + $0x80] sm:$0xff] %v1118_v17  ;;  %1178 = vst [vmem:[%s1938_s4 + $0x88] sm:$0xff] %v1119_v37  ;;  %v696_v29 = vmul.f32 0.01, %v684_v39  ;;  %v697_v32 = vmul.f32 0.01, %v685_v19  ;;  %v674_v16 = vpop.permute.xlu0 %673 }
 0x486   :  { %v1120_v50 = vmax.f32 %v1096_v34, %v1108_v38  ;;  %v1121_v46 = vmax.f32 %v1097_v35, %v1109_v2  ;;  %v686_v48 = vadd.f32 %v674_v16, %v644_v21  ;;  %v687_v25 = vadd.f32 %v674_v16, %v645_v45  ;;  %v1083_v13 = vpop.permute.xlu1 %1082 }
 0x487   :  { %v708_v20 = vmax.f32 %v684_v39, %v696_v29  ;;  %v709_v52 = vmax.f32 %v685_v19, %v697_v32  ;;  %v1098_v54 = vadd.f32 %v1083_v13, %v1056_v4  ;;  %v1099_v23 = vadd.f32 %v1083_v13, %v1057_v9 }
 0x488   :  { %1179 = vst [vmem:[%s1938_s4 + $0x90] sm:$0xff] %v1120_v50  ;;  %1180 = vst [vmem:[%s1938_s4 + $0x98] sm:$0xff] %v1121_v46  ;;  %v698_v47 = vmul.f32 0.01, %v686_v48  ;;  %v699_v6 = vmul.f32 0.01, %v687_v25 }
 0x489   :  { %720 = vst [vmem:[%s1938_s4 + $0x40] sm:$0xff] %v708_v20  ;;  %721 = vst [vmem:[%s1938_s4 + $0x48] sm:$0xff] %v709_v52  ;;  %v1110_v33 = vmul.f32 0.01, %v1098_v54  ;;  %v1111_v31 = vmul.f32 0.01, %v1099_v23  ;;  %v1088_v51 = vpop.permute.xlu0 %1087 }
 0x48a   :  { %v710_v10 = vmax.f32 %v686_v48, %v698_v47  ;;  %v711_v53 = vmax.f32 %v687_v25, %v699_v6  ;;  %v1100_v57 = vadd.f32 %v1088_v51, %v1058_v44  ;;  %v1101_v59 = vadd.f32 %v1088_v51, %v1059_v3 }
 0x48b   :  { %v1122_v14 = vmax.f32 %v1098_v54, %v1110_v33  ;;  %v1123_v22 = vmax.f32 %v1099_v23, %v1111_v31 }
 0x48c   :  { %722 = vst [vmem:[%s1938_s4 + $0x50] sm:$0x3f] %v710_v10  ;;  %723 = vst [vmem:[%s1938_s4 + $0x58] sm:$0x3f] %v711_v53  ;;  %v1112_v56 = vmul.f32 0.01, %v1100_v57 }
 0x48d   :  { %v1113_v12 = vmul.f32 0.01, %v1101_v59  ;;  %1181 = vst [vmem:[%s1938_s4 + $0xa0] sm:$0xff] %v1122_v14  ;;  %1182 = vst [vmem:[%s1938_s4 + $0xa8] sm:$0xff] %v1123_v22 }
 0x48e   :  { %v1124_v24 = vmax.f32 %v1100_v57, %v1112_v56 }
 0x48f   :  { %v1125_v18 = vmax.f32 %v1101_v59, %v1113_v12 }
 0x490   :  { %1183 = vst [vmem:[%s1938_s4 + $0xb0] sm:$0x3f] %v1124_v24 }
 0x491   :  { %1184 = vst [vmem:[%s1938_s4 + $0xb8] sm:$0x3f] %v1125_v18 }

</bundles_post_ra>
